<compile_context>
chip_gen: v6e
topology: v6e:2x2x1
jax: 0.10.0
libtpu: 0.0.40
codegen_flags: <defaults>
</compile_context>

<pallas_src>
import jax
import jax.numpy as jnp
from jax import lax
from jax.experimental import pallas as pl
from jax.experimental.pallas import tpu as pltpu

LN_EPS = 1e-5  # F.layer_norm default


def _round_up(n, m):
    return ((n + m - 1) // m) * m


def _ddit_final_kernel(x_ref, lnw_ref, scale_ref, wlin_ref, sbias_ref, o_ref, xn_ref):
    # x_ref:     (TR, H)      row tile of flattened x (depends only on outer grid axis)
    # lnw_ref:   (1, H)       LayerNorm weight
    # scale_ref: (1, 1, H)    scale row for c-batch i
    # wlin_ref:  (H, Cp)      final linear weight (pre-transposed, columns padded to 128)
    # sbias_ref: (1, 1, Cp)   folded bias: shift_i @ W_lin + b_lin (padded)
    # o_ref:     (1, TR, Cp)  output tile
    # xn_ref:    (TR, H)      VMEM scratch: cached LayerNorm output for this row tile

    # LayerNorm is identical for all Bc inner iterations of the same row tile:
    # compute it once (inner index == 0) and reuse from VMEM scratch.
    @pl.when(pl.program_id(1) == 0)
    def _():
        x = x_ref[...].astype(jnp.float32)                  # torch does .float()
        mu = jnp.mean(x, axis=-1, keepdims=True)
        xc = x - mu
        var = jnp.mean(xc * xc, axis=-1, keepdims=True)     # biased var (F.layer_norm)
        xn_ref[...] = (xc * lax.rsqrt(var + LN_EPS)) * lnw_ref[...]

    # modulate (shift already folded into the output bias) + final linear.
    y = xn_ref[...] * (1.0 + scale_ref[0])                  # (TR,H) * (1,H)
    out = jnp.dot(y, wlin_ref[...],
                  preferred_element_type=jnp.float32) + sbias_ref[0]   # (TR, Cp)
    o_ref[0] = out.astype(o_ref.dtype)


def ddit_final_layer(x, c, ln_w, w_ada, b_ada, w_lin, b_lin, *, block_rows=512):
    """x: (B,S,H) f32, c: (Bc,Cd) f32. Returns (Bc, B, S, Cout) f32."""
    B, S, H = x.shape
    Bc, _ = c.shape
    Cout = w_lin.shape[1]

    # ---- hoisted to plain XLA (cheap, depends only on c) -----------------------
    ada = c.astype(jnp.float32) @ w_ada + b_ada              # (Bc, 2H)
    shift = ada[:, :H]                                       # torch.chunk: shift first
    scale = ada[:, H:]
    shift_bias = shift @ w_lin + b_lin                       # (Bc, Cout) folded bias

    # ---- lane-dense output columns (multiple of 128), sliced off at the end ----
    Cp = _round_up(Cout, 128)
    w_lin_p = jnp.pad(w_lin, ((0, 0), (0, Cp - Cout)))                       # (H, Cp)
    sbias_p = jnp.pad(shift_bias, ((0, 0), (0, Cp - Cout))).reshape(Bc, 1, Cp)
    scale3 = scale.reshape(Bc, 1, H)
    lnw2 = ln_w.reshape(1, H).astype(jnp.float32)

    # ---- flatten (B, S) -> rows, tile rows in multiples of 8 -------------------
    R = B * S
    TR = min(block_rows, _round_up(R, 8))                    # rows per tile (mult of 8)
    Rp = _round_up(R, TR)
    x2 = jnp.pad(x.reshape(R, H), ((0, Rp - R), (0, 0)))     # zero rows -> xn = 0, safe

    grid = (Rp // TR, Bc)   # outer: row tiles (x constant across inner); inner: c-batch

    out = pl.pallas_call(
        _ddit_final_kernel,
        out_shape=jax.ShapeDtypeStruct((Bc, Rp, Cp), x.dtype),
        grid_spec=pltpu.PrefetchScalarGridSpec(
            num_scalar_prefetch=0,
            grid=grid,
            in_specs=[
                pl.BlockSpec((TR, H), lambda r, i: (r, 0)),        # x rows (outer-only idx)
                pl.BlockSpec((1, H), lambda r, i: (0, 0)),         # LN weight
                pl.BlockSpec((1, 1, H), lambda r, i: (i, 0, 0)),   # scale_i
                pl.BlockSpec((H, Cp), lambda r, i: (0, 0)),        # W_lin (padded)
                pl.BlockSpec((1, 1, Cp), lambda r, i: (i, 0, 0)),  # folded shift bias
            ],
            out_specs=pl.BlockSpec((1, TR, Cp), lambda r, i: (i, r, 0)),
            scratch_shapes=[pltpu.VMEM((TR, H), jnp.float32)],     # cached LN output
        ),
        compiler_params=pltpu.CompilerParams(
            dimension_semantics=("parallel", "arbitrary"),
            vmem_limit_bytes=64 * 1024 * 1024,   # valid on v5e/v6e/v7x
        ),
    )(x2, lnw2, scale3, w_lin_p, sbias_p)

    return out[:, :R, :Cout].reshape(Bc, B, S, Cout)


def _reference(x, c, ln_w, w_ada, b_ada, w_lin, b_lin):
    H = x.shape[-1]
    ada = c @ w_ada + b_ada                                   # (Bc, 2H)
    shift = ada[:, None, None, :H]                            # matches torch broadcast
    scale = ada[:, None, None, H:]
    mu = x.mean(-1, keepdims=True)
    var = ((x - mu) ** 2).mean(-1, keepdims=True)
    xn = (x - mu) / jnp.sqrt(var + LN_EPS) * ln_w
    y = xn[None] * (1.0 + scale) + shift                      # (Bc, B, S, H)
    return y @ w_lin + b_lin                                  # (Bc, B, S, Cout)


if __name__ == "__main__":
    B, S, H = 2, 16, 32
    cond_dim, out_channels = 16, 48

    key = jax.random.PRNGKey(0)
    kx, kc, kw1, kb1, kw2, kb2 = jax.random.split(key, 6)

    x = jax.random.normal(kx, (B, S, H), dtype=jnp.float32)
    c = jax.random.normal(kc, (B, cond_dim), dtype=jnp.float32)

    # Parameter shapes per __init__ (stored pre-transposed for the kernel):
    #   adaLN_modulation: Linear(cond_dim, 2*H)  -> W^T: (cond_dim, 2H), b: (2H,)
    #   linear:           Linear(H, out_channels)-> W^T: (H, Cout),      b: (Cout,)
    #   norm_final:       weight (H,)
    w_ada = 0.05 * jax.random.normal(kw1, (cond_dim, 2 * H), dtype=jnp.float32)
    b_ada = 0.05 * jax.random.normal(kb1, (2 * H,), dtype=jnp.float32)
    w_lin = 0.05 * jax.random.normal(kw2, (H, out_channels), dtype=jnp.float32)
    b_lin = 0.05 * jax.random.normal(kb2, (out_channels,), dtype=jnp.float32)
    ln_w = jnp.ones((H,), dtype=jnp.float32)

    ref = _reference(x, c, ln_w, w_ada, b_ada, w_lin, b_lin)

    # Default row tiling (single row tile at these shapes).
    out = ddit_final_layer(x, c, ln_w, w_ada, b_ada, w_lin, b_lin)
    out = jax.block_until_ready(out)
    assert out.shape == (B, B, S, out_channels), out.shape
    assert jnp.allclose(out, ref, atol=1e-5, rtol=1e-5), float(jnp.max(jnp.abs(out - ref)))

    # Smaller row tile: exercises multi-step outer grid + LN cache reset per tile.
    out2 = ddit_final_layer(x, c, ln_w, w_ada, b_ada, w_lin, b_lin, block_rows=16)
    out2 = jax.block_until_ready(out2)
    assert jnp.allclose(out2, ref, atol=1e-5, rtol=1e-5), float(jnp.max(jnp.abs(out2 - ref)))

    print("KERNEL_OK")
</pallas_src>

<mosaic_0001>
module attributes {stable_mosaic.version = 11 : i64} {
  func.func @_ddit_final_kernel(%arg0: i32, %arg1: i32, %arg2: memref<32x32xf32, #tpu.memory_space<vmem>>, %arg3: memref<1x32xf32, #tpu.memory_space<vmem>>, %arg4: memref<1x1x32xf32, #tpu.memory_space<vmem>>, %arg5: memref<32x128xf32, #tpu.memory_space<vmem>>, %arg6: memref<1x1x128xf32, #tpu.memory_space<vmem>>, %arg7: memref<1x32x128xf32, #tpu.memory_space<vmem>>, %arg8: memref<32x32xf32, #tpu.memory_space<vmem>>) attributes {dimension_semantics = [#tpu.dimension_semantics<parallel>, #tpu.dimension_semantics<arbitrary>], iteration_bounds = array<i64: 1, 2>, scalar_prefetch = 0 : i64, scratch_operands = 1 : i64, tpu.core_type = #tpu.core_type<tc>, window_params = [{transform_indices = @transform_0, window_bounds = array<i64: 32, 32>}, {pipeline_mode = #tpu.pipeline_mode<synchronous>, transform_indices = @transform_1, window_bounds = array<i64: 1, 32>}, {transform_indices = @transform_2, window_bounds = array<i64: 1, 1, 32>}, {pipeline_mode = #tpu.pipeline_mode<synchronous>, transform_indices = @transform_3, window_bounds = array<i64: 32, 128>}, {transform_indices = @transform_4, window_bounds = array<i64: 1, 1, 128>}, {transform_indices = @transform_5, window_bounds = array<i64: 1, 32, 128>}]} {
    %c0_i32 = arith.constant 0 : i32
    %0 = arith.cmpi eq, %arg1, %c0_i32 : i32
    %1 = arith.extui %0 : i1 to i32
    %c0_i32_0 = arith.constant 0 : i32
    %2 = arith.cmpi ne, %1, %c0_i32_0 : i32
    scf.if %2 {
      %c0_14 = arith.constant 0 : index
      %c0_15 = arith.constant 0 : index
      %19 = vector.load %arg2[%c0_14, %c0_15] : memref<32x32xf32, #tpu.memory_space<vmem>>, vector<32x32xf32>
      %cst_16 = arith.constant dense<0.000000e+00> : vector<32xf32>
      %20 = vector.multi_reduction <add>, %19, %cst_16 [1] : vector<32x32xf32> to vector<32xf32>
      %21 = vector.shape_cast %20 : vector<32xf32> to vector<32x1xf32>
      %cst_17 = arith.constant 3.200000e+01 : f32
      %22 = vector.broadcast %cst_17 : f32 to vector<32x1xf32>
      %23 = arith.divf %21, %22 : vector<32x1xf32>
      %24 = vector.broadcast %23 : vector<32x1xf32> to vector<32x32xf32>
      %25 = arith.subf %19, %24 : vector<32x32xf32>
      %26 = arith.mulf %25, %25 : vector<32x32xf32>
      %cst_18 = arith.constant dense<0.000000e+00> : vector<32xf32>
      %27 = vector.multi_reduction <add>, %26, %cst_18 [1] : vector<32x32xf32> to vector<32xf32>
      %28 = vector.shape_cast %27 : vector<32xf32> to vector<32x1xf32>
      %cst_19 = arith.constant 3.200000e+01 : f32
      %29 = vector.broadcast %cst_19 : f32 to vector<32x1xf32>
      %30 = arith.divf %28, %29 : vector<32x1xf32>
      %cst_20 = arith.constant 9.99999974E-6 : f32
      %31 = vector.broadcast %cst_20 : f32 to vector<32x1xf32>
      %32 = arith.addf %30, %31 : vector<32x1xf32>
      %33 = math.rsqrt %32 : vector<32x1xf32>
      %34 = vector.broadcast %33 : vector<32x1xf32> to vector<32x32xf32>
      %35 = arith.mulf %25, %34 : vector<32x32xf32>
      %c0_21 = arith.constant 0 : index
      %c0_22 = arith.constant 0 : index
      %36 = vector.load %arg3[%c0_21, %c0_22] : memref<1x32xf32, #tpu.memory_space<vmem>>, vector<1x32xf32>
      %37 = vector.broadcast %36 : vector<1x32xf32> to vector<32x32xf32>
      %38 = arith.mulf %35, %37 : vector<32x32xf32>
      %c0_23 = arith.constant 0 : index
      %c0_24 = arith.constant 0 : index
      %39 = vector.load %arg8[%c0_23, %c0_24] : memref<32x32xf32, #tpu.memory_space<vmem>>, vector<32x32xf32>
      tpu.vector_store %arg8[%c0_23, %c0_24], %38 {strides = array<i32>} : memref<32x32xf32, #tpu.memory_space<vmem>>, vector<32x32xf32>,
    } else {
    }
    %c0 = arith.constant 0 : index
    %c0_1 = arith.constant 0 : index
    %3 = vector.load %arg8[%c0, %c0_1] : memref<32x32xf32, #tpu.memory_space<vmem>>, vector<32x32xf32>
    %c0_2 = arith.constant 0 : index
    %c0_3 = arith.constant 0 : index
    %c0_4 = arith.constant 0 : index
    %4 = vector.load %arg4[%c0_2, %c0_3, %c0_4] : memref<1x1x32xf32, #tpu.memory_space<vmem>>, vector<1x1x32xf32>
    %5 = vector.shape_cast %4 : vector<1x1x32xf32> to vector<1x32xf32>
    %cst = arith.constant 1.000000e+00 : f32
    %6 = vector.broadcast %cst : f32 to vector<1x32xf32>
    %7 = arith.addf %6, %5 : vector<1x32xf32>
    %8 = vector.broadcast %7 : vector<1x32xf32> to vector<32x32xf32>
    %9 = arith.mulf %3, %8 : vector<32x32xf32>
    %c0_5 = arith.constant 0 : index
    %c0_6 = arith.constant 0 : index
    %10 = vector.load %arg5[%c0_5, %c0_6] : memref<32x128xf32, #tpu.memory_space<vmem>>, vector<32x128xf32>
    %cst_7 = arith.constant dense<0.000000e+00> : vector<32x128xf32>
    %11 = tpu.matmul %9, %10, %cst_7 {dimension_numbers = #tpu.dot_dimension_numbers<[1], [0], [0], [1], [0, 0, 1, 1], [], []>} : vector<32x32xf32>, vector<32x128xf32>, vector<32x128xf32> -> vector<32x128xf32>
    %c0_8 = arith.constant 0 : index
    %c0_9 = arith.constant 0 : index
    %c0_10 = arith.constant 0 : index
    %12 = vector.load %arg6[%c0_8, %c0_9, %c0_10] : memref<1x1x128xf32, #tpu.memory_space<vmem>>, vector<1x1x128xf32>
    %13 = vector.shape_cast %12 : vector<1x1x128xf32> to vector<1x128xf32>
    %14 = vector.broadcast %13 : vector<1x128xf32> to vector<32x128xf32>
    %15 = arith.addf %11, %14 : vector<32x128xf32>
    %c0_11 = arith.constant 0 : index
    %c0_12 = arith.constant 0 : index
    %c0_13 = arith.constant 0 : index
    %16 = vector.load %arg7[%c0_11, %c0_12, %c0_13] : memref<1x32x128xf32, #tpu.memory_space<vmem>>, vector<1x32x128xf32>
    %17 = vector.shape_cast %16 : vector<1x32x128xf32> to vector<32x128xf32>
    %18 = vector.shape_cast %15 : vector<32x128xf32> to vector<1x32x128xf32>
    tpu.vector_store %arg7[%c0_11, %c0_12, %c0_13], %18 {strides = array<i32>} : memref<1x32x128xf32, #tpu.memory_space<vmem>>, vector<1x32x128xf32>,
    return
  }
  func.func @transform_0(%arg0: i32, %arg1: i32) -> (i32, i32) {
    %c0_i32 = arith.constant 0 : i32
    %c0_i32_0 = arith.constant 0 : i32
    return %arg0, %c0_i32 : i32, i32
  }
  func.func @transform_1(%arg0: i32, %arg1: i32) -> (i32, i32) {
    %c0_i32 = arith.constant 0 : i32
    %c0_i32_0 = arith.constant 0 : i32
    %c0_i32_1 = arith.constant 0 : i32
    return %c0_i32, %c0_i32_0 : i32, i32
  }
  func.func @transform_2(%arg0: i32, %arg1: i32) -> (i32, i32, i32) {
    %c0_i32 = arith.constant 0 : i32
    %c0_i32_0 = arith.constant 0 : i32
    %c0_i32_1 = arith.constant 0 : i32
    return %arg1, %c0_i32, %c0_i32_0 : i32, i32, i32
  }
  func.func @transform_3(%arg0: i32, %arg1: i32) -> (i32, i32) {
    %c0_i32 = arith.constant 0 : i32
    %c0_i32_0 = arith.constant 0 : i32
    %c0_i32_1 = arith.constant 0 : i32
    return %c0_i32, %c0_i32_0 : i32, i32
  }
  func.func @transform_4(%arg0: i32, %arg1: i32) -> (i32, i32, i32) {
    %c0_i32 = arith.constant 0 : i32
    %c0_i32_0 = arith.constant 0 : i32
    %c0_i32_1 = arith.constant 0 : i32
    return %arg1, %c0_i32, %c0_i32_0 : i32, i32, i32
  }
  func.func @transform_5(%arg0: i32, %arg1: i32) -> (i32, i32, i32) {
    %c0_i32 = arith.constant 0 : i32
    %c0_i32_0 = arith.constant 0 : i32
    return %arg1, %arg0, %c0_i32 : i32, i32, i32
  }
}

</mosaic_0001>

<bundles_post_ra>
// kernel: tpu_custom_call.1
= control target key start
LH: loop header
LB: loop body
LE: loop exit
PB: predicated region body
PF: predicated region fallthrough
CT: control target
= control target key end

     0   :  { %10 = vsyncpa [#allocation4], 0  ;;  %s1128_s0 = inlined_call_operand.hbm [shape: f32[32,32], index: 0, kind: input, shape index: {}]   ;;  %s1129_s1 = inlined_call_operand.vmem [shape: f32[1,32], index: 1, kind: input, shape index: {}]   ;;  %s1130_s2 = inlined_call_operand.vmem [shape: f32[2,1,32], index: 2, kind: input, shape index: {}]   ;;  %s1131_s3 = inlined_call_operand.hbm [shape: f32[32,128], index: 3, kind: input, shape index: {}]   ;;  %s1132_s4 = inlined_call_operand.vmem [shape: f32[2,1,128], index: 4, kind: input, shape index: {}]   ;;  %s1133_s5 = inlined_call_operand.hbm [shape: f32[2,32,128], index: 5, kind: output, shape index: {}]  }
   0x1   :  { %11 = vsyncpa [#allocation7], 0 }
   0x2   :  { %12 = vsyncpa [#allocation5], 0 }
   0x3   :  { %14 = vsyncpa [#allocation5 + $0x1], 0  ;;  %s926_s18 = smov 0   ;;  %s928_s19 = smov 0  }
   0x4   :  { %s930_s20 = smov 0   ;;  %s932_s21 = smov 0  }
   0x5   :  { %s934_s22 = smov 0   ;;  %s936_s23 = smov 0  }
   0x6 LB: > { %s610_s24 = sadd.s32 4294967295, %s887_s23   ;;  %s611_s25 = sadd.s32 4294967294, %s887_s23   ;;  %s887_s23 = sphi %s936_s23, %s20_s23   ;;  %s883_s22 = sphi %s934_s22, %s1146_s22   ;;  %s879_s21 = sphi %s932_s21, %s1145_s21   ;;  %s875_s20 = sphi %s930_s20, %s1144_s20   ;;  %s871_s19 = sphi %s928_s19, %s1143_s19   ;;  %s867_s18 = sphi %s926_s18, %s1142_s18  }
   0x7   : > { %s29_s26 = sadd.s32 1, %s883_s22  ;;  %s161_s27 = sadd.s32 1, %s875_s20 }
   0x8   : > { %p30_p0 = scmp.ge.s32.totalorder %s29_s26, 2  ;;  %p171_p1 = scmp.ne.s32.totalorder %s875_s20, %s871_s19 }
   0x9   : > { %p172_p2 = scmp.eq.s32.totalorder %s610_s24, 1  ;;  %p177_p3 = scmp.ne.s32.totalorder %s871_s19, %s867_s18 }
   0xa   : > { %s1148_s26 = smov (%p30_p0, %s29_s26), 0  ;;  %p178_p5 = scmp.eq.s32.totalorder %s611_s25, 1 }
   0xb   : > { %p966_p4 = por %p172_p2, %p171_p1  ;;  %s156_s29 = ssub.s32 %s883_s22, %s1148_s26 }
   0xc   : > { %p612_p6 = scmp.ge.s32.totalorder %s887_s23, 1  ;;  %p159_p7 = scmp.eq.s32.totalorder %s156_s29, 0 }
   0xd   : > { %s1135_s28 = scalar_select %p966_p4, 1, 0 }
   0xe   : > { %p973_p8 = por %p178_p5, %p177_p3  ;;  %p185_p9 = scmp.lt.s32.totalorder %s887_s23, 3 }
   0xf   : > { %s979_s6 = scalar_select %p159_p7, %s875_s20, %s161_s27  }
  0x10   : > { %s1136_s30 = scalar_select %p973_p8, 1, 0 }
  0x11   : > { %p981_p10 = pnand %p612_p6, %p185_p9  ;;  %p985_p11 = scmp.eq.s32.totalorder %s610_s24, 0 }
  0x12   : > { %s889_s9 = smov [#allocation3]   ;;  %s890_s12 = smov [#allocation6]  }
  0x13   : > { %p673_p12 = pneg %p981_p10  ;;  %s200_s10 = sshll.u32 %s889_s9, 4  ;;  %s201_s10 = int_to_ptr.vmem [resolvable:$true] %s200_s10 }
  0x14   : > { %s216_s13 = sshll.u32 %s890_s12, 4  ;;  %s762_s14 = scalar_lea.vmem %s201_s10, 512  ;;  %s217_s13 = int_to_ptr.vmem [resolvable:$true] %s216_s13 }
  0x15   : > { %p993_p13 = pnand %p985_p11, %p673_p12  ;;  %p763_p1 = scmp.ne.s32.totalorder %s201_s10, %s762_s14 }
  0x16   : > { %p770_p5 = scmp.lt.s32.totalorder %s201_s10, %s201_s10  ;;  %p771_p6 = scmp.lt.s32.totalorder %s762_s14, %s762_s14 }
  0x17   : > { %p753_p0 = pneg %p993_p13 }
  0x18   : > { %p772_p7 = por %p771_p6, %p770_p5 }
  0x19   : > { %p765_p2 = pnand %p763_p1, %p753_p0 }
  0x1b   : > { %p766_p3 = pneg %p765_p2 }
  0x1d   : > { %p773_p9 = pnand %p772_p7, %p766_p3 }
  0x1f   : > { %776 = shalt.err (!%p773_p9)
}
  0x20   : > { %s891_s15 = smov 128   ;;  %s892_s16 = smov 8  }
  0x21   : > { %676 = dma.hbm_to_vmem [thread:$0]  (!%p993_p13), %s1128_s0, 512, %s201_s10, [#allocation4], %s891_s15, %s891_s15, %s892_s16  }
  0x22   : > { %s788_s25 = scalar_lea.vmem %s217_s13, 512  ;;  %p796_p8 = scmp.lt.s32.totalorder %s217_s13, %s217_s13 }
  0x23   : > { %p789_p12 = scmp.ne.s32.totalorder %s217_s13, %s788_s25  ;;  %p797_p4 = scmp.lt.s32.totalorder %s788_s25, %s788_s25 }
  0x25   : > { %p791_p1 = pnand %p789_p12, %p753_p0  ;;  %p798_p5 = por %p797_p4, %p796_p8 }
  0x27   : > { %p792_p2 = pneg %p791_p1 }
  0x29   : > { %p799_p3 = pnand %p798_p5, %p792_p2 }
  0x2b   : > { %802 = shalt.err (!%p799_p3)
}
  0x2c   : > { %679 = dma.hbm_to_vmem [thread:$0]  (!%p993_p13), %s1131_s3, 512, %s217_s13, [#allocation7], %s891_s15, %s891_s15, %s892_s16  }
  0x2d   : > { %244 = sbr.rel (%p981_p10) target bundleno = 599 (0x257), region = 40 }
  0x32   : > { %854 = dma.done.wait (%p985_p11), [#allocation4], 512  }
  0x33   : > { %856 = vsyncadd (%p985_p11), [#allocation4], 4294966784 }
  0x34   : > { %858 = dma.done.wait (%p985_p11), [#allocation7], 512  }
  0x35   : > { %860 = vsyncadd (%p985_p11), [#allocation7], 4294966784  ;;  %s274_s9 = sand.u32 1, %s871_s19   ;;  %p278_p4 = scmp.lt.s32.totalorder %s879_s21, 1 }
  0x36   : > { %s619_s7 = sshll.u32 %s274_s9, 5  ;;  %p620_p8 = scmp.ne.s32.totalorder %s879_s21, 0 }
  0x37   : > { %s1030_s10 = scalar_select %p278_p4, %s879_s21, 1 }
  0x38   : > { %s1040_s16 = scalar_lea.vmem [#allocation8], %s619_s7  ;;  %288 = sbr.rel (%p620_p8) target bundleno = 377 (0x179), region = 52 }
  0x39   : > { %s280_s13 = scalar_lea.vmem %s1130_s2, %s1030_s10  ;;  %s283_s8 = scalar_lea.vmem %s1132_s4, %s1030_s10 }
  0x3d   : > { %v289_v0 = vld [vmem:[#allocation3] sm:$0xff]  ;;  %vm293_vm0 = vcmask 261120   ;;  %v291_v1 = vld [vmem:[#allocation3 + $0x10] sm:$0xff]  ;;  %v290_v2 = vld [vmem:[#allocation3 + $0x8] sm:$0xff] }
  0x3e   : > { %v294_v3 = vsel %vm293_vm0, %v289_v0, 0.0  ;;  %v300_v4 = vsel %vm293_vm0, %v291_v1, 0.0  ;;  %v292_v5 = vld [vmem:[#allocation3 + $0x18] sm:$0xff]  ;;  %v297_v6 = vsel %vm293_vm0, %v290_v2, 0.0  ;;  %v621_v41 = vld [vmem:[%s1129_s1] ss:$0 sm:$0xff] }
  0x3f   : > { %295 = vadd.xlane.f32.xlu0 %v294_v3  ;;  %301 = vadd.xlane.f32.xlu1 %v300_v4  ;;  %v303_v7 = vsel %vm293_vm0, %v292_v5, 0.0 }
  0x43   : > { %298 = vadd.xlane.f32.xlu0 %v297_v6  ;;  %304 = vadd.xlane.f32.xlu1 %v303_v7 }
  0xc8   : > { %v296_v8 = vpop.xlane.xlu0 %295  ;;  %v302_v9 = vpop.xlane.xlu1 %301 }
  0xc9   : > { %v307_v10 = vmul.f32 0.03125, %v296_v8  ;;  %v309_v11 = vmul.f32 0.03125, %v302_v9 }
  0xcb   : > { %v311_v12 = vsub.f32 %v289_v0, %v307_v10  ;;  %v313_v13 = vsub.f32 %v291_v1, %v309_v11 }
  0xcc   : > { %v299_v14 = vpop.xlane.xlu0 %298  ;;  %v305_v15 = vpop.xlane.xlu1 %304 }
  0xcd   : > { %v308_v16 = vmul.f32 0.03125, %v299_v14  ;;  %v310_v17 = vmul.f32 0.03125, %v305_v15  ;;  %v315_v18 = vmul.f32 %v311_v12, %v311_v12  ;;  %v317_v19 = vmul.f32 %v313_v13, %v313_v13 }
  0xcf   : > { %v312_v20 = vsub.f32 %v290_v2, %v308_v16  ;;  %v314_v21 = vsub.f32 %v292_v5, %v310_v17  ;;  %v319_v22 = vsel %vm293_vm0, %v315_v18, 0.0  ;;  %v325_v23 = vsel %vm293_vm0, %v317_v19, 0.0 }
  0xd0   : > { %320 = vadd.xlane.f32.xlu0 %v319_v22 }
  0xd1   : > { %v316_v24 = vmul.f32 %v312_v20, %v312_v20  ;;  %v318_v25 = vmul.f32 %v314_v21, %v314_v21 }
  0xd3   : > { %v322_v26 = vsel %vm293_vm0, %v316_v24, 0.0  ;;  %v328_v27 = vsel %vm293_vm0, %v318_v25, 0.0 }
  0xd4   : > { %326 = vadd.xlane.f32.xlu0 %v325_v23  ;;  %323 = vadd.xlane.f32.xlu1 %v322_v26 }
  0xd8   : > { %329 = vadd.xlane.f32.xlu1 %v328_v27 }
 0x159   : > { %v321_v28 = vpop.xlane.xlu0 %320 }
 0x15a   : > { %v331_v29 = vmul.f32 0.03125, %v321_v28 }
 0x15c   : > { %v335_v30 = vadd.f32 1e-05, %v331_v29 }
 0x15d   : > { %v324_v31 = vpop.xlane.xlu1 %323  ;;  %v327_v32 = vpop.xlane.xlu0 %326 }
 0x15e   : > { %743 = vrsqrt.f32 %v335_v30  ;;  %v332_v33 = vmul.f32 0.03125, %v324_v31  ;;  %v333_v34 = vmul.f32 0.03125, %v327_v32 }
 0x160   : > { %v336_v35 = vadd.f32 1e-05, %v332_v33  ;;  %v337_v36 = vadd.f32 1e-05, %v333_v34 }
 0x161   : > { %v330_v37 = vpop.xlane.xlu1 %329 }
 0x162   : > { %745 = vrsqrt.f32 %v336_v35  ;;  %v334_v38 = vmul.f32 0.03125, %v330_v37 }
 0x163   : > { %747 = vrsqrt.f32 %v337_v36 }
 0x164   : > { %v338_v39 = vadd.f32 1e-05, %v334_v38 }
 0x166   : > { %749 = vrsqrt.f32 %v338_v39 }
 0x16b   : > { %v744_v40 = vpop.eup %743 }
 0x16c   : > { %v343_v42 = vmul.f32 %v744_v40, %v311_v12 }
 0x16e   : > { %v354_v43 = vmul.f32 %v621_v41, %v343_v42 }
 0x16f   : > { %v746_v44 = vpop.eup %745 }
 0x170   : > { %v748_v45 = vpop.eup %747  ;;  %358 = vst.msk [vmem:[#allocation2] sm:$0xff] %vm293_vm0, %v354_v43  ;;  %v344_v46 = vmul.f32 %v746_v44, %v312_v20 }
 0x171   : > { %v345_v47 = vmul.f32 %v748_v45, %v313_v13 }
 0x172   : > { %v355_v48 = vmul.f32 %v621_v41, %v344_v46 }
 0x173   : > { %v750_v49 = vpop.eup %749  ;;  %v356_v50 = vmul.f32 %v621_v41, %v345_v47 }
 0x174   : > { %359 = vst.msk [vmem:[#allocation2 + $0x8] sm:$0xff] %vm293_vm0, %v355_v48  ;;  %v346_v51 = vmul.f32 %v750_v49, %v314_v21 }
 0x175   : > { %360 = vst.msk [vmem:[#allocation2 + $0x10] sm:$0xff] %vm293_vm0, %v356_v50 }
 0x176   : > { %v357_v52 = vmul.f32 %v621_v41, %v346_v51 }
 0x178   : > { %361 = vst.msk [vmem:[#allocation2 + $0x18] sm:$0xff] %vm293_vm0, %v357_v52 }
 0x179 PF: > { %v381_v53 = vld [vmem:[#allocation6 + $0x18] sm:$0xff]  ;;  %v380_v54 = vld [vmem:[#allocation6 + $0x10] sm:$0xff]  ;;  %v369_v55 = vlaneseq  ;;  %v366_v56 = vld [vmem:[%s280_s13] sm:$0x1]  ;;  %vm389_vm1 = vcmask 261120   ;;  %s632_s11 = sshll.u32 %s879_s21, 9 }
 0x17a   : > { %641 = vmatprep.subr.mxu0 %v381_v53  ;;  %655 = vmatprep.subr.mxu1 %v381_v53  ;;  %v379_v57 = vld [vmem:[#allocation6 + $0x8] sm:$0xff]  ;;  %v367_v58 = vadd.f32 1.0, %v366_v56  ;;  %v378_v60 = vld [vmem:[#allocation6] sm:$0xff]  ;;  %s507_s12 = sshll.u32 %s1040_s16, 4  ;;  %s1073_s15 = scalar_lea.hbm %s1133_s5, %s632_s11  ;;  %s1075_s12 = int_to_ptr.vmem [resolvable:$true] %s507_s12 }
 0x17b   : > { %642 = vmatpush3.msra.mxu0 %v381_v53  ;;  %659 = vmatpush3.msra.mxu1 %v381_v53  ;;  %v370_v59 = vshrl.u32 %v369_v55, 7  ;;  %v362_v62 = vld [vmem:[#allocation2] sm:$0xff]  ;;  %v363_v0 = vld [vmem:[#allocation2 + $0x8] sm:$0xff]  ;;  %s1083_s21 = scalar_lea.sflag [#allocation5], %s274_s9  ;;  %s803_s10 = scalar_lea.vmem %s1075_s12, 512 }
 0x17c   : > { %643 = vmatprep.subr.mxu0 %v380_v54  ;;  %656 = vmatprep.subr.mxu1 %v380_v54  ;;  %v364_v63 = vld [vmem:[#allocation2 + $0x10] sm:$0xff]  ;;  %v622_v7 = vld [vmem:[%s283_s8] ss:$0 sm:$0xff]  ;;  %p804_p10 = scmp.ne.s32.totalorder %s1075_s12, %s803_s10  ;;  %p1140_p11 = scmp.ne.s32.totalorder %s1135_s28, 0 }
 0x17d   : > { %644 = vmatpush3.msra.mxu0 %v380_v54  ;;  %660 = vmatpush3.msra.mxu1 %v380_v54  ;;  %v371_v61 = vsub.s32 0, %v370_v59  ;;  %s893_s8 = smov [#allocation8]  }
 0x17e   : > { %645 = vmatprep.subr.mxu0 %v379_v57  ;;  %657 = vmatprep.subr.mxu1 %v379_v57  ;;  %p805_p13 = pnand %p804_p10, %p1140_p11  ;;  %s807_s17 = sshll.u32 %s893_s8, 4  ;;  %s808_s17 = int_to_ptr.vmem [resolvable:$false] %s807_s17 }
 0x17f   : > { %646 = vmatpush3.msra.mxu0 %v379_v57  ;;  %661 = vmatpush3.msra.mxu1 %v379_v57  ;;  %v372_v1 = vrot.slane %v367_v58, %v371_v61  ;;  %v365_v2 = vld [vmem:[#allocation2 + $0x18] sm:$0xff]  ;;  %s809_s24 = scalar_lea.vmem %s808_s17, 1024  ;;  %p810_p6 = scmp.lt.s32.totalorder %s1075_s12, %s808_s17 }
 0x180   : > { %647 = vmatprep.subr.mxu0 %v378_v60  ;;  %658 = vmatprep.subr.mxu1 %v378_v60  ;;  %p806_p0 = pneg %p805_p13  ;;  %p811_p7 = scmp.lt.s32.totalorder %s809_s24, %s803_s10 }
 0x181   : > { %648 = vmatpush3.msra.mxu0 %v378_v60  ;;  %662 = vmatpush3.msra.mxu1 %v378_v60  ;;  %v374_v3 = vmul.f32 %v372_v1, %v362_v62  ;;  %v376_v4 = vmul.f32 %v372_v1, %v364_v63  ;;  %v375_v5 = vmul.f32 %v372_v1, %v363_v0 }
 0x182   : > { %v377_v6 = vmul.f32 %v372_v1, %v365_v2  ;;  %p812_p9 = por %p811_p7, %p810_p6 }
 0x183   : > { %649 = vmatprep.mubr.msk.f32.mxu0 %vm389_vm1, %v374_v3  ;;  %652 = vmatprep.mubr.msk.f32.mxu1 %vm389_vm1, %v376_v4 }
 0x184   : > { %650 = vmatmul.mubr.msk.f32.vlgmr.msra.gmra.mxu0 %vm389_vm1, %v375_v5  ;;  %653 = vmatmul.mubr.msk.f32.vlgmr.msra.gmra.mxu1 %vm389_vm1, %v377_v6  ;;  %p813_p12 = pnand %p812_p9, %p806_p0 }
 0x244   : > { %v651_v8 = vpop.f32.mrf.mxu0  ;;  %v654_v9 = vpop.f32.mrf.mxu1 }
 0x245   : > { %v474_v10 = vadd.f32 %v651_v8, %v622_v7  ;;  %v484_v11 = vadd.f32 %v654_v9, %v622_v7 }
 0x246   : > { %v468_v12 = vpop.f32.mrf.mxu0  ;;  %v478_v13 = vpop.f32.mrf.mxu1 }
 0x247   : > { %488 = vst [vmem:[%s1040_s16 + $0x8] sm:$0xff] %v474_v10  ;;  %490 = vst [vmem:[%s1040_s16 + $0x18] sm:$0xff] %v484_v11  ;;  %v469_v14 = vadd.f32 %v622_v7, %v468_v12  ;;  %v479_v15 = vadd.f32 %v622_v7, %v478_v13 }
 0x249   : > { %487 = vst [vmem:[%s1040_s16] sm:$0xff] %v469_v14  ;;  %489 = vst [vmem:[%s1040_s16 + $0x10] sm:$0xff] %v479_v15 }
 0x24a   : > { %816 = shalt.err (!%p813_p12)
}
 0x24b   : > { %s817_s9 = scalar_lea.hbm %s1073_s15, 512  ;;  %s821_s27 = scalar_lea.hbm %s1133_s5, 1024 }
 0x24c   : > { %p818_p1 = scmp.ne.s32.totalorder %s1073_s15, %s817_s9  ;;  %p822_p3 = scmp.lt.s32.totalorder %s1073_s15, %s1133_s5 }
 0x24d   : > { %p823_p4 = scmp.lt.s32.totalorder %s821_s27, %s817_s9 }
 0x24e   : > { %p819_p2 = pnand %p818_p1, %p1140_p11 }
 0x24f   : > { %p824_p8 = por %p823_p4, %p822_p3 }
 0x250   : > { %p820_p5 = pneg %p819_p2 }
 0x252   : > { %p825_p10 = pnand %p824_p8, %p820_p5 }
 0x254   : > { %828 = shalt.err (!%p825_p10)
}
 0x255   : > { %s894_s11 = smov 128   ;;  %s895_s13 = smov 8  }
 0x256   : > { %671 = dma.vmem_to_hbm [thread:$0]  (%p1140_p11), %s1075_s12, 512, %s1073_s15, %s1083_s21, %s894_s11, %s894_s11, %s895_s13  }
 0x257 PF: > { %p688_p13 = scmp.ge.s32.totalorder %s887_s23, 2  ;;  %s522_s14 = sand.u32 1, %s867_s18  }
 0x258   : > { %p1141_p0 = scmp.ne.s32.totalorder %s1136_s30, 0  ;;  %s523_s10 = scalar_lea.sflag [#allocation5], %s522_s14 }
 0x25a   : > { %p681_p6 = pnand %p688_p13, %p1141_p0 }
 0x25c   : > { %p682_p7 = pneg %p681_p6 }
 0x25e   : > { %862 = dma.done.wait (%p682_p7), %s523_s10, 512  }
 0x25f   : > { %864 = vsyncadd (%p682_p7), %s523_s10, 4294966784  ;;  %s20_s23 = sadd.s32 1, %s887_s23   ;;  %s1142_s18 = smov %s871_s19 }
 0x260   : > { %p17_p9 = scmp.ge.s32.totalorder %s20_s23, 4   ;;  %s1143_s19 = smov %s875_s20 }
 0x261   : > { %s1144_s20 = smov %s979_s6  ;;  %s1145_s21 = smov %s883_s22 }
 0x262   : > { %s1146_s22 = smov %s1148_s26  ;;  %19 = sbr.rel (!%p17_p9) target bundleno = 6 (0x6), region = 92 }
 0x267   :  { %528 = vsyncpa [#allocation4], 1 }
 0x268   :  { %530 = vsyncpa [#allocation4 + $0x1], 1 }
 0x269   :  { %531 = vsyncpa [#allocation7], 1 }
 0x26a   :  { %532 = vsyncpa [#allocation5], 1 }
 0x26b   :  { %534 = vsyncpa [#allocation5 + $0x1], 1 }

</bundles_post_ra>
